<compile_context>
chip_gen: v5e
topology: v5e:2x2
jax: 0.10.0
libtpu: 0.0.40
codegen_flags: <defaults>
</compile_context>

<pallas_src>
import functools

import jax
import jax.numpy as jnp
from jax.experimental import pallas as pl
from jax.experimental.pallas import tpu as pltpu


def _quadruple_loss_kernel(x_ref, d_ref, out_ref, sum_acc, cnt_acc, *,
                           domain_num, margin, half_rows, total_rows,
                           tile_rows, needs_mask):
    i = pl.program_id(0)
    n_bins = 2 * domain_num

    @pl.when(i == 0)
    def _init():
        sum_acc[...] = jnp.zeros_like(sum_acc)
        cnt_acc[...] = jnp.zeros_like(cnt_acc)

    # ---- accumulate per-(half, domain) sums & counts for this row tile ----
    x = x_ref[...]                                     # [tile, F], native dtype
    labels = d_ref[...]                                # [tile, 1] int32

    row_idx = i * tile_rows + jax.lax.broadcasted_iota(
        jnp.int32, (tile_rows, 1), 0)
    half = jnp.where(row_idx >= half_rows, 1, 0)       # 0 = posi, 1 = nega
    ext_label = labels + half * domain_num             # [tile, 1] in [0, 2*dn)

    cols = jax.lax.broadcasted_iota(jnp.int32, (tile_rows, n_bins), 1)
    hit = cols == ext_label
    if needs_mask:                                      # static: only when padded
        hit = hit & (row_idx < total_rows)
    onehot = jnp.where(hit, 1.0, 0.0)                   # [tile, 2*dn] f32

    contract_rows = (((0,), (0,)), ((), ()))            # C = onehot^T @ x on the MXU
    sum_acc[...] += jax.lax.dot_general(
        onehot.astype(x.dtype), x, contract_rows,
        preferred_element_type=jnp.float32)
    cnt_acc[...] += jax.lax.dot_general(
        onehot, jnp.ones((tile_rows, 1), jnp.float32), contract_rows,
        preferred_element_type=jnp.float32)

    # ---- finalize: softmax anchors, KL terms, hinge ----
    @pl.when(i == pl.num_programs(0) - 1)
    def _finalize():
        dn = domain_num
        inv_dn = 1.0 / dn

        cnt = jnp.maximum(cnt_acc[...], 1.0)            # scatter_mean: empty bin -> 0
        mean = sum_acc[...] / cnt                       # [2*dn, F]

        # stable log-softmax; anchors = exp(log_anchors)
        z = mean - jnp.max(mean, axis=-1, keepdims=True)
        lse = jnp.log(jnp.sum(jnp.exp(z), axis=-1, keepdims=True))
        log_anchors = z - lse                           # [2*dn, F]
        anchors = jnp.exp(log_anchors)

        row_ids = jax.lax.broadcasted_iota(jnp.int32, (2 * dn, 1), 0)
        posi_sel = jnp.where(row_ids < dn, 1.0, 0.0)    # [2*dn, 1]
        nega_sel = 1.0 - posi_sel

        posi_mean = jnp.sum(anchors * posi_sel, axis=0, keepdims=True) * inv_dn
        nega_mean = jnp.sum(anchors * nega_sel, axis=0, keepdims=True) * inv_dn
        log_pm = jnp.log(posi_mean)
        log_nm = jnp.log(nega_mean)

        # KLDivLoss(reduction='batchmean'): sum(t * (log t - x)) / dn
        kl_posi = jnp.sum(posi_sel * (posi_mean * (log_pm - log_anchors))) * inv_dn
        kl_nega = jnp.sum(nega_sel * (nega_mean * (log_nm - log_anchors))) * inv_dn
        # inputs/targets with dn identical (broadcast) rows -> batchmean cancels dn
        kl_pm_nm = jnp.sum(nega_mean * (log_nm - log_pm))
        kl_nm_pm = jnp.sum(posi_mean * (log_pm - log_nm))

        loss = margin + kl_posi + kl_nega - (kl_pm_nm + kl_nm_pm) * 0.5
        out_ref[0] = jnp.maximum(loss, 0.0)             # ReLU


def _round_up(a, b):
    return (a + b - 1) // b * b


def quadruple_loss(x, D, *, domain_num, margin, tile_rows=None):
    """JAX/Pallas equivalent of Quadruple_Loss.forward(input, D)."""
    # Keep the MXU contraction in the input's native float dtype.
    if x.dtype not in (jnp.float32, jnp.bfloat16):
        x = x.astype(jnp.float32)

    total_rows, feat = x.shape
    assert total_rows % 2 == 0, "torch.chunk(input, 2) expects an even batch"
    half_rows = total_rows // 2
    n_bins = 2 * domain_num

    d2 = D.astype(jnp.int32).reshape(total_rows, 1)

    # Row-tile choice: largest tile that keeps (x + labels) * double-buffer
    # comfortably inside the smallest scoped-VMEM budget (v7x / v5e).
    if tile_rows is None:
        bytes_per_row = feat * x.dtype.itemsize + 4
        max_rows_by_vmem = max(8, (8 * 1024 * 1024) // max(bytes_per_row, 1))
        tile_rows = min(1024, max_rows_by_vmem, _round_up(total_rows, 8))
    tile_rows = max(8, _round_up(tile_rows, 8))

    padded_rows = _round_up(total_rows, tile_rows)
    needs_mask = padded_rows != total_rows
    x_p, d_p = x, d2
    if needs_mask:
        pad = padded_rows - total_rows
        x_p = jnp.pad(x, ((0, pad), (0, 0)))
        d_p = jnp.pad(d2, ((0, pad), (0, 0)))

    grid = (padded_rows // tile_rows,)

    kernel = functools.partial(
        _quadruple_loss_kernel,
        domain_num=int(domain_num), margin=float(margin),
        half_rows=half_rows, total_rows=total_rows, tile_rows=tile_rows,
        needs_mask=needs_mask)

    cost = pl.CostEstimate(
        flops=2 * padded_rows * feat * n_bins + 4 * padded_rows * feat,
        transcendentals=4 * n_bins * feat,
        bytes_accessed=(padded_rows * feat * x.dtype.itemsize
                        + padded_rows * 4 + 4))

    out = pl.pallas_call(
        kernel,
        out_shape=jax.ShapeDtypeStruct((1,), jnp.float32),
        grid_spec=pltpu.PrefetchScalarGridSpec(
            num_scalar_prefetch=0,
            grid=grid,
            in_specs=[
                pl.BlockSpec((tile_rows, feat), lambda i: (i, 0)),  # x rows (native dtype)
                pl.BlockSpec((tile_rows, 1), lambda i: (i, 0)),     # domain labels
            ],
            out_specs=pl.BlockSpec(memory_space=pltpu.MemorySpace.SMEM),
            scratch_shapes=[
                pltpu.VMEM((n_bins, feat), jnp.float32),   # per-bin sum accumulator
                pltpu.VMEM((n_bins, 1), jnp.float32),      # per-bin count accumulator
            ]),
        compiler_params=pltpu.CompilerParams(
            dimension_semantics=("arbitrary",)),
        cost_estimate=cost,
    )(x_p, d_p)

    return out[0]


def _reference(x, D, *, domain_num, margin):
    """Pure-JAX reference mirroring the PyTorch semantics."""
    posi, nega = jnp.split(x.astype(jnp.float32), 2, axis=0)
    posi_D, nega_D = jnp.split(D, 2, axis=0)

    def scatter_mean(v, idx):
        oh = jax.nn.one_hot(idx, domain_num, dtype=jnp.float32)      # [B, dn]
        s = oh.T @ v                                                  # [dn, F]
        c = jnp.maximum(jnp.sum(oh, axis=0), 1.0)[:, None]
        return s / c

    pa = jax.nn.softmax(scatter_mean(posi, posi_D), axis=-1)
    na = jax.nn.softmax(scatter_mean(nega, nega_D), axis=-1)
    pam = jnp.broadcast_to(pa.mean(axis=0, keepdims=True), pa.shape)
    nam = jnp.broadcast_to(na.mean(axis=0, keepdims=True), na.shape)

    def kld_batchmean(log_input, target):
        return jnp.sum(target * (jnp.log(target) - log_input)) / target.shape[0]

    loss = (margin
            + kld_batchmean(jnp.log(pa), pam)
            + kld_batchmean(jnp.log(na), nam)
            - (kld_batchmean(jnp.log(pam), nam) + kld_batchmean(jnp.log(nam), pam)) / 2)
    return jnp.maximum(loss, 0.0)


if __name__ == "__main__":
    key = jax.random.PRNGKey(0)
    TWO_B, F, DOMAIN_NUM, MARGIN = 40, 32, 3, 0.5   # 2B = 40 samples, 32 features

    kx, kd = jax.random.split(key, 2)
    x = jax.random.normal(kx, (TWO_B, F), jnp.float32)
    D = jax.random.randint(kd, (TWO_B,), 0, DOMAIN_NUM, jnp.int32)

    # small tile so the demo exercises multi-step accumulation + padding mask
    out = quadruple_loss(x, D, domain_num=DOMAIN_NUM, margin=MARGIN, tile_rows=16)
    out = jax.block_until_ready(out)

    ref = _reference(x, D, domain_num=DOMAIN_NUM, margin=MARGIN)
    assert jnp.allclose(out, ref, rtol=1e-4, atol=1e-5), (out, ref)

    print("KERNEL_OK")
</pallas_src>

<mosaic_0001>
module attributes {stable_mosaic.version = 11 : i64} {
  func.func @_quadruple_loss_kernel(%arg0: i32, %arg1: memref<16x32xf32, #tpu.memory_space<vmem>>, %arg2: memref<16x1xi32, #tpu.memory_space<vmem>>, %arg3: memref<1xf32, #tpu.memory_space<smem>>, %arg4: memref<6x32xf32, #tpu.memory_space<vmem>>, %arg5: memref<6x1xf32, #tpu.memory_space<vmem>>) attributes {dimension_semantics = [#tpu.dimension_semantics<arbitrary>], iteration_bounds = array<i64: 3>, scalar_prefetch = 0 : i64, scratch_operands = 2 : i64, tpu.core_type = #tpu.core_type<tc>, window_params = [{transform_indices = @transform_0, window_bounds = array<i64: 16, 32>}, {transform_indices = @transform_1, window_bounds = array<i64: 16, 1>}, {transform_indices = @transform_2, window_bounds = array<i64: 1>}]} {
    %c0_i32 = arith.constant 0 : i32
    %0 = arith.cmpi eq, %arg0, %c0_i32 : i32
    %1 = arith.extui %0 : i1 to i32
    %c0_i32_0 = arith.constant 0 : i32
    %2 = arith.cmpi ne, %1, %c0_i32_0 : i32
    scf.if %2 {
      %cst_18 = arith.constant 0.000000e+00 : f32
      %39 = vector.broadcast %cst_18 : f32 to vector<6x32xf32>
      %c0_19 = arith.constant 0 : index
      %c0_20 = arith.constant 0 : index
      %40 = vector.load %arg4[%c0_19, %c0_20] : memref<6x32xf32, #tpu.memory_space<vmem>>, vector<6x32xf32>
      tpu.vector_store %arg4[%c0_19, %c0_20], %39 {strides = array<i32>} : memref<6x32xf32, #tpu.memory_space<vmem>>, vector<6x32xf32>,
      %cst_21 = arith.constant 0.000000e+00 : f32
      %41 = vector.broadcast %cst_21 : f32 to vector<6x1xf32>
      %c0_22 = arith.constant 0 : index
      %c0_23 = arith.constant 0 : index
      %42 = vector.load %arg5[%c0_22, %c0_23] : memref<6x1xf32, #tpu.memory_space<vmem>>, vector<6x1xf32>
      tpu.vector_store %arg5[%c0_22, %c0_23], %41 {strides = array<i32>} : memref<6x1xf32, #tpu.memory_space<vmem>>, vector<6x1xf32>,
    } else {
    }
    %c0 = arith.constant 0 : index
    %c0_1 = arith.constant 0 : index
    %3 = vector.load %arg1[%c0, %c0_1] : memref<16x32xf32, #tpu.memory_space<vmem>>, vector<16x32xf32>
    %c0_2 = arith.constant 0 : index
    %c0_3 = arith.constant 0 : index
    %4 = vector.load %arg2[%c0_2, %c0_3] : memref<16x1xi32, #tpu.memory_space<vmem>>, vector<16x1xi32>
    %c16_i32 = arith.constant 16 : i32
    %5 = arith.muli %arg0, %c16_i32 : i32
    %6 = tpu.iota {dimensions = array<i32: 0>} : vector<16x1xi32>
    %7 = vector.broadcast %5 : i32 to vector<16x1xi32>
    %8 = arith.addi %7, %6 : vector<16x1xi32>
    %c20_i32 = arith.constant 20 : i32
    %9 = vector.broadcast %c20_i32 : i32 to vector<16x1xi32>
    %10 = arith.cmpi sge, %8, %9 : vector<16x1xi32>
    %c1_i32 = arith.constant 1 : i32
    %c0_i32_4 = arith.constant 0 : i32
    %11 = vector.broadcast %c1_i32 : i32 to vector<16x1xi32>
    %12 = vector.broadcast %c0_i32_4 : i32 to vector<16x1xi32>
    %13 = arith.select %10, %11, %12 : vector<16x1xi1>, vector<16x1xi32>
    %c3_i32 = arith.constant 3 : i32
    %14 = vector.broadcast %c3_i32 : i32 to vector<16x1xi32>
    %15 = arith.muli %13, %14 : vector<16x1xi32>
    %16 = arith.addi %4, %15 : vector<16x1xi32>
    %17 = tpu.iota {dimensions = array<i32: 1>} : vector<16x6xi32>
    %18 = vector.broadcast %16 : vector<16x1xi32> to vector<16x6xi32>
    %19 = arith.cmpi eq, %17, %18 : vector<16x6xi32>
    %c40_i32 = arith.constant 40 : i32
    %20 = vector.broadcast %c40_i32 : i32 to vector<16x1xi32>
    %21 = arith.cmpi slt, %8, %20 : vector<16x1xi32>
    %22 = vector.broadcast %21 : vector<16x1xi1> to vector<16x6xi1>
    %23 = arith.andi %19, %22 : vector<16x6xi1>
    %cst = arith.constant 1.000000e+00 : f32
    %cst_5 = arith.constant 0.000000e+00 : f32
    %24 = vector.broadcast %cst : f32 to vector<16x6xf32>
    %25 = vector.broadcast %cst_5 : f32 to vector<16x6xf32>
    %26 = arith.select %23, %24, %25 : vector<16x6xi1>, vector<16x6xf32>
    %c0_6 = arith.constant 0 : index
    %c0_7 = arith.constant 0 : index
    %27 = vector.load %arg4[%c0_6, %c0_7] : memref<6x32xf32, #tpu.memory_space<vmem>>, vector<6x32xf32>
    %cst_8 = arith.constant dense<0.000000e+00> : vector<6x32xf32>
    %28 = tpu.matmul %26, %3, %cst_8 {dimension_numbers = #tpu.dot_dimension_numbers<[0], [0], [1], [1], [0, 1, 1, 1], [], []>} : vector<16x6xf32>, vector<16x32xf32>, vector<6x32xf32> -> vector<6x32xf32>
    %29 = arith.addf %27, %28 : vector<6x32xf32>
    %c0_9 = arith.constant 0 : index
    %c0_10 = arith.constant 0 : index
    %30 = vector.load %arg4[%c0_9, %c0_10] : memref<6x32xf32, #tpu.memory_space<vmem>>, vector<6x32xf32>
    tpu.vector_store %arg4[%c0_9, %c0_10], %29 {strides = array<i32>} : memref<6x32xf32, #tpu.memory_space<vmem>>, vector<6x32xf32>,
    %c0_11 = arith.constant 0 : index
    %c0_12 = arith.constant 0 : index
    %31 = vector.load %arg5[%c0_11, %c0_12] : memref<6x1xf32, #tpu.memory_space<vmem>>, vector<6x1xf32>
    %cst_13 = arith.constant 1.000000e+00 : f32
    %32 = vector.broadcast %cst_13 : f32 to vector<16x1xf32>
    %cst_14 = arith.constant dense<0.000000e+00> : vector<6x1xf32>
    %33 = tpu.matmul %26, %32, %cst_14 {dimension_numbers = #tpu.dot_dimension_numbers<[0], [0], [1], [1], [0, 1, 1, 1], [], []>} : vector<16x6xf32>, vector<16x1xf32>, vector<6x1xf32> -> vector<6x1xf32>
    %34 = arith.addf %31, %33 : vector<6x1xf32>
    %c0_15 = arith.constant 0 : index
    %c0_16 = arith.constant 0 : index
    %35 = vector.load %arg5[%c0_15, %c0_16] : memref<6x1xf32, #tpu.memory_space<vmem>>, vector<6x1xf32>
    tpu.vector_store %arg5[%c0_15, %c0_16], %34 {strides = array<i32>} : memref<6x1xf32, #tpu.memory_space<vmem>>, vector<6x1xf32>,
    %c2_i32 = arith.constant 2 : i32
    %36 = arith.cmpi eq, %arg0, %c2_i32 : i32
    %37 = arith.extui %36 : i1 to i32
    %c0_i32_17 = arith.constant 0 : i32
    %38 = arith.cmpi ne, %37, %c0_i32_17 : i32
    scf.if %38 {
      %c0_18 = arith.constant 0 : index
      %c0_19 = arith.constant 0 : index
      %39 = vector.load %arg5[%c0_18, %c0_19] : memref<6x1xf32, #tpu.memory_space<vmem>>, vector<6x1xf32>
      %cst_20 = arith.constant 1.000000e+00 : f32
      %40 = vector.broadcast %cst_20 : f32 to vector<6x1xf32>
      %41 = arith.maximumf %39, %40 : vector<6x1xf32>
      %c0_21 = arith.constant 0 : index
      %c0_22 = arith.constant 0 : index
      %42 = vector.load %arg4[%c0_21, %c0_22] : memref<6x32xf32, #tpu.memory_space<vmem>>, vector<6x32xf32>
      %43 = vector.broadcast %41 : vector<6x1xf32> to vector<6x32xf32>
      %44 = arith.divf %42, %43 : vector<6x32xf32>
      %cst_23 = arith.constant dense<0xFF800000> : vector<6xf32>
      %45 = vector.multi_reduction <maximumf>, %44, %cst_23 [1] : vector<6x32xf32> to vector<6xf32>
      %46 = vector.shape_cast %45 : vector<6xf32> to vector<6x1xf32>
      %47 = vector.broadcast %46 : vector<6x1xf32> to vector<6x32xf32>
      %48 = arith.subf %44, %47 : vector<6x32xf32>
      %49 = math.exp %48 : vector<6x32xf32>
      %cst_24 = arith.constant dense<0.000000e+00> : vector<6xf32>
      %50 = vector.multi_reduction <add>, %49, %cst_24 [1] : vector<6x32xf32> to vector<6xf32>
      %51 = vector.shape_cast %50 : vector<6xf32> to vector<6x1xf32>
      %52 = math.log %51 : vector<6x1xf32>
      %53 = vector.broadcast %52 : vector<6x1xf32> to vector<6x32xf32>
      %54 = arith.subf %48, %53 : vector<6x32xf32>
      %55 = math.exp %54 : vector<6x32xf32>
      %56 = tpu.iota {dimensions = array<i32: 0>} : vector<6x1xi32>
      %c3_i32_25 = arith.constant 3 : i32
      %57 = vector.broadcast %c3_i32_25 : i32 to vector<6x1xi32>
      %58 = arith.cmpi slt, %56, %57 : vector<6x1xi32>
      %cst_26 = arith.constant 1.000000e+00 : f32
      %cst_27 = arith.constant 0.000000e+00 : f32
      %59 = vector.broadcast %cst_26 : f32 to vector<6x1xf32>
      %60 = vector.broadcast %cst_27 : f32 to vector<6x1xf32>
      %61 = arith.select %58, %59, %60 : vector<6x1xi1>, vector<6x1xf32>
      %cst_28 = arith.constant 1.000000e+00 : f32
      %62 = vector.broadcast %cst_28 : f32 to vector<6x1xf32>
      %63 = arith.subf %62, %61 : vector<6x1xf32>
      %64 = vector.broadcast %61 : vector<6x1xf32> to vector<6x32xf32>
      %65 = arith.mulf %55, %64 : vector<6x32xf32>
      %cst_29 = arith.constant dense<0.000000e+00> : vector<32xf32>
      %66 = vector.multi_reduction <add>, %65, %cst_29 [0] : vector<6x32xf32> to vector<32xf32>
      %67 = vector.shape_cast %66 : vector<32xf32> to vector<1x32xf32>
      %cst_30 = arith.constant 0.333333343 : f32
      %68 = vector.broadcast %cst_30 : f32 to vector<1x32xf32>
      %69 = arith.mulf %67, %68 : vector<1x32xf32>
      %70 = vector.broadcast %63 : vector<6x1xf32> to vector<6x32xf32>
      %71 = arith.mulf %55, %70 : vector<6x32xf32>
      %cst_31 = arith.constant dense<0.000000e+00> : vector<32xf32>
      %72 = vector.multi_reduction <add>, %71, %cst_31 [0] : vector<6x32xf32> to vector<32xf32>
      %73 = vector.shape_cast %72 : vector<32xf32> to vector<1x32xf32>
      %cst_32 = arith.constant 0.333333343 : f32
      %74 = vector.broadcast %cst_32 : f32 to vector<1x32xf32>
      %75 = arith.mulf %73, %74 : vector<1x32xf32>
      %76 = math.log %69 : vector<1x32xf32>
      %77 = math.log %75 : vector<1x32xf32>
      %78 = vector.broadcast %76 : vector<1x32xf32> to vector<6x32xf32>
      %79 = arith.subf %78, %54 : vector<6x32xf32>
      %80 = vector.broadcast %69 : vector<1x32xf32> to vector<6x32xf32>
      %81 = arith.mulf %80, %79 : vector<6x32xf32>
      %82 = vector.broadcast %61 : vector<6x1xf32> to vector<6x32xf32>
      %83 = arith.mulf %82, %81 : vector<6x32xf32>
      %84 = vector.shape_cast %83 : vector<6x32xf32> to vector<1x6x32xf32>
      %cst_33 = arith.constant dense<0.000000e+00> : vector<1xf32>
      %85 = vector.multi_reduction <add>, %84, %cst_33 [1, 2] : vector<1x6x32xf32> to vector<1xf32>
      %86 = vector.shape_cast %85 : vector<1xf32> to vector<1x1x1xf32>
      %87 = vector.extract %86[0, 0, 0] : f32 from vector<1x1x1xf32>
      %cst_34 = arith.constant 0.333333343 : f32
      %88 = arith.mulf %87, %cst_34 : f32
      %89 = vector.broadcast %77 : vector<1x32xf32> to vector<6x32xf32>
      %90 = arith.subf %89, %54 : vector<6x32xf32>
      %91 = vector.broadcast %75 : vector<1x32xf32> to vector<6x32xf32>
      %92 = arith.mulf %91, %90 : vector<6x32xf32>
      %93 = vector.broadcast %63 : vector<6x1xf32> to vector<6x32xf32>
      %94 = arith.mulf %93, %92 : vector<6x32xf32>
      %95 = vector.shape_cast %94 : vector<6x32xf32> to vector<1x6x32xf32>
      %cst_35 = arith.constant dense<0.000000e+00> : vector<1xf32>
      %96 = vector.multi_reduction <add>, %95, %cst_35 [1, 2] : vector<1x6x32xf32> to vector<1xf32>
      %97 = vector.shape_cast %96 : vector<1xf32> to vector<1x1x1xf32>
      %98 = vector.extract %97[0, 0, 0] : f32 from vector<1x1x1xf32>
      %cst_36 = arith.constant 0.333333343 : f32
      %99 = arith.mulf %98, %cst_36 : f32
      %100 = arith.subf %77, %76 : vector<1x32xf32>
      %101 = arith.mulf %75, %100 : vector<1x32xf32>
      %102 = vector.shape_cast %101 : vector<1x32xf32> to vector<1x1x32xf32>
      %cst_37 = arith.constant dense<0.000000e+00> : vector<1xf32>
      %103 = vector.multi_reduction <add>, %102, %cst_37 [1, 2] : vector<1x1x32xf32> to vector<1xf32>
      %104 = vector.shape_cast %103 : vector<1xf32> to vector<1x1x1xf32>
      %105 = vector.extract %104[0, 0, 0] : f32 from vector<1x1x1xf32>
      %106 = arith.subf %76, %77 : vector<1x32xf32>
      %107 = arith.mulf %69, %106 : vector<1x32xf32>
      %108 = vector.shape_cast %107 : vector<1x32xf32> to vector<1x1x32xf32>
      %cst_38 = arith.constant dense<0.000000e+00> : vector<1xf32>
      %109 = vector.multi_reduction <add>, %108, %cst_38 [1, 2] : vector<1x1x32xf32> to vector<1xf32>
      %110 = vector.shape_cast %109 : vector<1xf32> to vector<1x1x1xf32>
      %111 = vector.extract %110[0, 0, 0] : f32 from vector<1x1x1xf32>
      %cst_39 = arith.constant 5.000000e-01 : f32
      %112 = arith.addf %cst_39, %88 : f32
      %113 = arith.addf %112, %99 : f32
      %114 = arith.addf %105, %111 : f32
      %cst_40 = arith.constant 5.000000e-01 : f32
      %115 = arith.mulf %114, %cst_40 : f32
      %116 = arith.subf %113, %115 : f32
      %cst_41 = arith.constant 0.000000e+00 : f32
      %117 = arith.maximumf %116, %cst_41 : f32
      %c0_42 = arith.constant 0 : index
      %118 = memref.load %arg3[%c0_42] : memref<1xf32, #tpu.memory_space<smem>>
      memref.store %117, %arg3[%c0_42] : memref<1xf32, #tpu.memory_space<smem>>
    } else {
    }
    return
  }
  func.func @transform_0(%arg0: i32) -> (i32, i32) {
    %c0_i32 = arith.constant 0 : i32
    %c0_i32_0 = arith.constant 0 : i32
    return %arg0, %c0_i32 : i32, i32
  }
  func.func @transform_1(%arg0: i32) -> (i32, i32) {
    %c0_i32 = arith.constant 0 : i32
    %c0_i32_0 = arith.constant 0 : i32
    return %arg0, %c0_i32 : i32, i32
  }
  func.func @transform_2(%arg0: i32) -> i32 {
    %c0_i32 = arith.constant 0 : i32
    %c0_i32_0 = arith.constant 0 : i32
    return %c0_i32 : i32
  }
}

</mosaic_0001>

<bundles_post_ra>
// kernel: tpu_custom_call.1
= control target key start
LH: loop header
LB: loop body
LE: loop exit
PB: predicated region body
PF: predicated region fallthrough
CT: control target
= control target key end

     0   :  { %7 = vsyncpa [#allocation5], 0  ;;  %s581_s9 = smov 0   ;;  %s624_s0 = inlined_call_operand.vmem [shape: f32[48,32], index: 0, kind: input, shape index: {}]   ;;  %s625_s1 = inlined_call_operand.vmem [shape: s32[48,1], index: 1, kind: input, shape index: {}]   ;;  %s626_s2 = inlined_call_operand.hbm [shape: f32[1], index: 2, kind: output, shape index: {}]  }
   0x1 LB: > { %s587_s10 = sadd.s32 4294967295, %s556_s9   ;;  %p474_p0 = scmp.ge.s32.totalorder %s556_s9, 1  ;;  %s556_s9 = sphi %s581_s9, %s13_s9  }
   0x2   : > { %p120_p1 = scmp.lt.s32.totalorder %s556_s9, 4 }
   0x4   : > { %p121_p2 = pnand %p474_p0, %p120_p1 }
   0x5   : > { %s475_s11 = sshll.u32 (!%p121_p2), %s587_s10, 1  ;;  %p479_p4 = scmp.ne.s32.totalorder (!%p121_p2), %s587_s10, 0 }
   0x6   : > { %124 = sbr.rel (%p121_p2) target bundleno = 1086 (0x43e), region = 28  ;;  %p143_p3 = scmp.lt.s32.totalorder (!%p121_p2), %s475_s11, 5 }
   0xb   : > { %s628_s11 = smov (!%p143_p3, %s475_s11), 5  ;;  %157 = sbr.rel (%p479_p4) target bundleno = 19 (0x13), region = 32 }
   0xc   : > { %s476_s12 = sshll.u32 %s628_s11, 3 }
   0xd   : > { %s595_s15 = scalar_lea.vmem %s624_s0, %s476_s12  ;;  %s152_s18 = scalar_lea.vmem %s625_s1, %s476_s12 }
  0x10   : > { %vm158_vm0 = vcmask 259072   ;;  %vm160_vm1 = vcmask 5120   ;;  %v558_v0 = vmov 0.0  }
  0x11   : > { %159 = vst.msk [vmem:[#allocation2] sm:$0x3f] %vm158_vm0, %v558_v0 }
  0x12   : > { %161 = vst.msk [vmem:[#allocation3] sm:$0x3f] %vm160_vm1, %v558_v0 }
  0x13 PF: > { %s480_s19 = sshll.u32 %s587_s10, 4  ;;  %v167_v1 = vlaneseq  ;;  %v559_v2 = vmov 0   ;;  %v164_v8 = vld [vmem:[%s152_s18] sm:$0xff]  ;;  %v165_v14 = vld [vmem:[%s152_s18 + $0x8] sm:$0xff]  ;;  %v560_v17 = vmov 1.0   ;;  %v561_v20 = vmov 0.0  }
  0x14   : > { %518 = vset.pattern.permute.xlu0 %v559_v2  ;;  %v170_v3 = vstv %s480_s19  ;;  %v163_v16 = vld [vmem:[%s595_s15 + $0x8] sm:$0xff]  ;;  %276 = vmatpush.msra.mxu1 %v560_v17  ;;  %v162_v24 = vld [vmem:[%s595_s15] sm:$0xff]  ;;  %vm234_vm10 = vcmask 130048   ;;  %vm259_vm11 = vcmask 259072   ;;  %vm283_vm12 = vcmask 5120   ;;  %p483_p5 = scmp.ne.s32.totalorder %s587_s10, 2 }
  0x15   : > { %v602_v4 = vshrl.u32 %v167_v1, 7  ;;  %252 = vmatpush.msra.mxu0 %v163_v16  ;;  %v182_v18 = vand.u32 127, %v167_v1  ;;  %s564_s3 = smov (!%p483_p5), 0.0  }
  0x16   : > { %277 = vmatpush.msra.mxu1 %v560_v17 }
  0x17   : > { %v169_v5 = vadd.s32 8, %v602_v4  ;;  %v171_v6 = vadd.s32 %v170_v3, %v602_v4  ;;  %253 = vmatpush.msra.mxu0 %v162_v24 }
  0x18   : > { %v201_v26 = vld [vmem:[#allocation2] sm:$0x3f] }
  0x19   : > { %v172_v7 = vadd.s32 %v170_v3, %v169_v5  ;;  %vm173_vm2 = vcmp.ge.s32.totalorder %v171_v6, 20  ;;  %vm191_vm4 = vcmp.lt.s32.totalorder %v171_v6, 40  ;;  %v261_v27 = vld [vmem:[#allocation3] sm:$0x3f] }
  0x1a   : > { %v175_v9 = vsel %vm173_vm2, 1, %v559_v2 }
  0x1b   : > { %vm174_vm3 = vcmp.ge.s32.totalorder %v172_v7, 20  ;;  %v177_v10 = vmul.u32 3, %v175_v9  ;;  %vm192_vm7 = vcmp.lt.s32.totalorder %v172_v7, 40 }
  0x1c   : > { %v176_v11 = vsel %vm174_vm3, 1, %v559_v2 }
  0x1d   : > { %v179_v12 = vadd.s32 %v177_v10, %v164_v8  ;;  %v178_v13 = vmul.u32 3, %v176_v11 }
  0x1f   : > { %184 = vperm.xlu0 %518, %v179_v12   ;;  %v180_v15 = vadd.s32 %v178_v13, %v165_v14 }
  0x27   : > { %187 = vperm.xlu0 %518, %v180_v15  }
  0x91   : > { %v185_v19 = vpop.permute.xlu0 %184 }
  0x92   : > { %vm189_vm5 = vcmp.eq.s32.totalorder %v182_v18, %v185_v19 }
  0x93   : > { %vm197_vm6 = vmand %vm189_vm5, %vm191_vm4 }
  0x94   : > { %v199_v21 = vsel %vm197_vm6, 1.0, %v561_v20 }
  0x95   : > { %202 = vxpose.xlu1.b32.start [1/2] (short) (narrow) %v199_v21, 8 }
  0x99   : > { %v188_v22 = vpop.permute.xlu0 %187 }
  0x9a   : > { %vm190_vm8 = vcmp.eq.s32.totalorder %v182_v18, %v188_v22 }
  0x9b   : > { %vm198_vm9 = vmand %vm190_vm8, %vm192_vm7 }
  0x9c   : > { %v200_v23 = vsel %vm198_vm9, 1.0, %v561_v20 }
  0x9d   : > { %203 = vxpose.xlu1.b32.end [2/2] (short) (narrow) %v200_v23, 8 }
 0x139   : > { %v218_v25 = vpop.trf.xlu1 }
 0x13a   : > { %481 = vmatmul.msk.f32.vlgmr.msra.gmra.mxu0 %vm234_vm10, %v218_v25  ;;  %482 = vmatmul.msk.f32.vlgmr.msra.gmra.mxu1 %vm234_vm10, %v218_v25 }
 0x1b7   : > { %v255_v28 = vpop.f32.mrf.mxu0  ;;  %v279_v29 = vpop.f32.mrf.mxu1  ;;  %288 = sbr.rel (%p483_p5) target bundleno = 1080 (0x438), region = 36 }
 0x1b8   : > { %v258_v30 = vadd.f32 %v255_v28, %v201_v26  ;;  %v282_v31 = vadd.f32 %v279_v29, %v261_v27 }
 0x1ba   : > { %260 = vst.msk [vmem:[#allocation2] sm:$0x3f] %vm259_vm11, %v258_v30 }
 0x1bb   : > { %284 = vst.msk [vmem:[#allocation3] sm:$0x3f] %vm283_vm12, %v282_v31 }
 0x1bc   : > { %v562_v33 = vmov 0   ;;  %vm326_vm1 = vcmp.lt.s32.totalorder %v602_v4, 3  ;;  %v563_v59 = vmov 0.0   ;;  %vm381_vm2 = vcmask 253952  }
 0x1bd   : > { %519 = vset.pattern.permute.xlu0 %v562_v33  ;;  %v327_v60 = vsel %vm326_vm1, 1.0, %v563_v59 }
 0x1be   : > { %v328_v61 = vsub.f32 1.0, %v327_v60 }
 0x1c1   : > { %v291_v43 = vld [vmem:[#allocation2] sm:$0x3f] }
 0x1c2   : > { %v289_v32 = vld [vmem:[#allocation3] sm:$0x3f] }
 0x1c3   : > { %v290_v34 = vmax.f32 %v289_v32, 1.0 }
 0x1c5   : > { %294 = vperm.xlu0 %519, %v290_v34  }
 0x237   : > { %v295_v35 = vpop.permute.xlu0 %294 }
 0x238   : > { %520 = vrcp.f32 %v295_v35  ;;  %v308_v39 = vand.u32 2147483648, %v295_v35  ;;  %v306_v41 = vand.u32 2147483647, %v295_v35  ;;  %vm302_vm14 = vweird.f32 %v295_v35 }
 0x23a   : > { %v309_v44 = vor.u32 1.1754944e-38, %v308_v39  ;;  %vm307_vm0 = vcmp.eq.f32.partialorder %v306_v41, 8.507059e+37 }
 0x23e   : > { %v521_v36 = vpop.eup %520 }
 0x23f   : > { %v298_v37 = vmul.f32 %v521_v36, %v295_v35  ;;  %vm303_vm13 = vweird.f32 %v521_v36 }
 0x240   : > { %vm304_vm15 = vmor %vm302_vm14, %vm303_vm13 }
 0x241   : > { %v299_v38 = vsub.f32 1.0, %v298_v37 }
 0x243   : > { %v300_v40 = vmul.f32 %v521_v36, %v299_v38 }
 0x245   : > { %v301_v42 = vadd.f32 %v521_v36, %v300_v40 }
 0x247   : > { %v305_v45 = vsel %vm304_vm15, %v521_v36, %v301_v42 }
 0x248   : > { %v310_v46 = vsel %vm307_vm0, %v309_v44, %v305_v45 }
 0x249   : > { %v311_v47 = vmul.f32 %v310_v46, %v291_v43 }
 0x24b   : > { %v312_v48 = vsel %vm259_vm11, %v311_v47, -inf }
 0x24c   : > { %313 = vmax.xlane.f32.xlu0 %v312_v48 }
 0x2bf   : > { %v314_v49 = vpop.xlane.xlu0 %313 }
 0x2c0   : > { %v315_v50 = vsub.f32 %v311_v47, %v314_v49 }
 0x2c2   : > { %v316_v51 = vmul.f32 1.442695, %v315_v50 }
 0x2c4   : > { %522 = vpow2.f32 %v316_v51 }
 0x2ca   : > { %v523_v52 = vpop.eup %522 }
 0x2cb   : > { %v318_v53 = vsel %vm259_vm11, %v523_v52, 0.0 }
 0x2cc   : > { %319 = vadd.xlane.f32.xlu1 %v318_v53 }
 0x33f   : > { %v320_v54 = vpop.xlane.xlu1 %319 }
 0x340   : > { %524 = vlog2.f32 %v320_v54 }
 0x346   : > { %v525_v55 = vpop.eup %524 }
 0x347   : > { %v322_v56 = vmul.f32 0.6931472, %v525_v55 }
 0x349   : > { %v323_v57 = vsub.f32 %v315_v50, %v322_v56 }
 0x34b   : > { %v324_v58 = vmul.f32 1.442695, %v323_v57 }
 0x34d   : > { %526 = vpow2.f32 %v324_v58 }
 0x353   : > { %v527_v62 = vpop.eup %526 }
 0x354   : > { %v338_v63 = vmul.f32 %v527_v62, %v328_v61  ;;  %v329_v0 = vmul.f32 %v527_v62, %v327_v60 }
 0x356   : > { %v339_v1 = vsel %vm259_vm11, %v338_v63, 0.0  ;;  %v330_v2 = vsel %vm259_vm11, %v329_v0, 0.0 }
 0x357   : > { %v340_v3 = vrot.slane %v339_v1, 4  ;;  %v331_v5 = vrot.slane %v330_v2, 4 }
 0x359   : > { %v341_v6 = vadd.f32 %v340_v3, %v339_v1  ;;  %v332_v7 = vadd.f32 %v331_v5, %v330_v2 }
 0x35b   : > { %v342_v8 = vrot.slane %v341_v6, 2  ;;  %v333_v9 = vrot.slane %v332_v7, 2 }
 0x35d   : > { %v343_v10 = vadd.f32 %v342_v8, %v341_v6  ;;  %v334_v4 = vadd.f32 %v333_v9, %v332_v7 }
 0x35f   : > { %v344_v11 = vrot.slane %v343_v10, 1  ;;  %v335_v12 = vrot.slane %v334_v4, 1 }
 0x361   : > { %v345_v13 = vadd.f32 %v344_v11, %v343_v10  ;;  %v336_v14 = vadd.f32 %v335_v12, %v334_v4 }
 0x363   : > { %v346_v15 = vmul.f32 0.33333334, %v345_v13  ;;  %v337_v16 = vmul.f32 0.33333334, %v336_v14 }
 0x365   : > { %528 = vlog2.f32 %v346_v15 }
 0x366   : > { %530 = vlog2.f32 %v337_v16 }
 0x36b   : > { %v529_v17 = vpop.eup %528 }
 0x36c   : > { %v531_v18 = vpop.eup %530  ;;  %v350_v19 = vmul.f32 0.6931472, %v529_v17 }
 0x36d   : > { %v348_v20 = vmul.f32 0.6931472, %v531_v18 }
 0x36e   : > { %v365_v21 = vsub.f32 %v350_v19, %v323_v57 }
 0x36f   : > { %v351_v22 = vsub.f32 %v348_v20, %v323_v57  ;;  %v379_v28 = vsub.f32 %v350_v19, %v348_v20  ;;  %v392_v30 = vsub.f32 %v348_v20, %v350_v19 }
 0x370   : > { %v366_v23 = vmul.f32 %v365_v21, %v346_v15 }
 0x371   : > { %v352_v24 = vmul.f32 %v351_v22, %v337_v16  ;;  %v380_v31 = vmul.f32 %v379_v28, %v346_v15  ;;  %v393_v32 = vmul.f32 %v392_v30, %v337_v16 }
 0x372   : > { %v367_v25 = vmul.f32 %v366_v23, %v328_v61 }
 0x373   : > { %v353_v26 = vmul.f32 %v352_v24, %v327_v60  ;;  %v382_v33 = vsel %vm381_vm2, %v380_v31, 0.0  ;;  %v394_v34 = vsel %vm381_vm2, %v393_v32, 0.0 }
 0x374   : > { %v368_v27 = vsel %vm259_vm11, %v367_v25, 0.0 }
 0x375   : > { %369 = vadd.xlane.f32.xlu2 %v368_v27  ;;  %v354_v29 = vsel %vm259_vm11, %v353_v26, 0.0 }
 0x376   : > { %355 = vadd.xlane.f32.xlu1 %v354_v29 }
 0x37d   : > { %383 = vadd.xlane.f32.xlu2 %v382_v33 }
 0x37e   : > { %395 = vadd.xlane.f32.xlu1 %v394_v34 }
 0x3e8   : > { %v370_v35 = vpop.xlane.xlu2 %369 }
 0x3e9   : > { %v371_v36 = vrot.slane %v370_v35, 4  ;;  %v356_v37 = vpop.xlane.xlu1 %355 }
 0x3ea   : > { %v357_v38 = vrot.slane %v356_v37, 4 }
 0x3eb   : > { %v372_v39 = vadd.f32 %v371_v36, %v370_v35 }
 0x3ec   : > { %v358_v40 = vadd.f32 %v357_v38, %v356_v37 }
 0x3ed   : > { %v373_v41 = vrot.slane %v372_v39, 2 }
 0x3ee   : > { %v359_v42 = vrot.slane %v358_v40, 2 }
 0x3ef   : > { %v374_v43 = vadd.f32 %v373_v41, %v372_v39 }
 0x3f0   : > { %v384_v44 = vpop.xlane.xlu2 %383  ;;  %v360_v45 = vadd.f32 %v359_v42, %v358_v40 }
 0x3f1   : > { %v385_v46 = vrot.slane %v384_v44, 4  ;;  %v396_v47 = vpop.xlane.xlu1 %395  ;;  %v375_v48 = vrot.slane %v374_v43, 1 }
 0x3f2   : > { %v397_v49 = vrot.slane %v396_v47, 4  ;;  %v361_v50 = vrot.slane %v360_v45, 1 }
 0x3f3   : > { %v386_v51 = vadd.f32 %v385_v46, %v384_v44  ;;  %v376_v52 = vadd.f32 %v375_v48, %v374_v43 }
 0x3f4   : > { %v398_v53 = vadd.f32 %v397_v49, %v396_v47  ;;  %v362_v54 = vadd.f32 %v361_v50, %v360_v45 }
 0x3f5   : > { %v387_v55 = vrot.slane %v386_v51, 2 }
 0x3f6   : > { %v399_v56 = vrot.slane %v398_v53, 2  ;;  %488 = vpush %v362_v54 }
 0x3f7   : > { %v388_v57 = vadd.f32 %v387_v55, %v386_v51  ;;  %490 = vpush %v376_v52 }
 0x3f8   : > { %v400_v58 = vadd.f32 %v399_v56, %v398_v53 }
 0x3f9   : > { %v389_v59 = vrot.slane %v388_v57, 1 }
 0x3fa   : > { %v401_v60 = vrot.slane %v400_v58, 1 }
 0x3fb   : > { %v390_v61 = vadd.f32 %v389_v59, %v388_v57 }
 0x3fc   : > { %v402_v62 = vadd.f32 %v401_v60, %v400_v58 }
 0x3fd   : > { %492 = vpush %v390_v61 }
 0x3fe   : > { %494 = vpush %v402_v62 }
 0x427   : > { %s489_s20 = spop %488 }
 0x428   : > { %s364_s21 = smul.f32 0.33333334, %s489_s20  ;;  %s491_s22 = spop %490 }
 0x429   : > { %s378_s26 = smul.f32 0.33333334, %s491_s22 }
 0x42a   : > { %s404_s23 = sadd.f32 0.5, %s364_s21 }
 0x42c   : > { %s405_s28 = sadd.f32 %s404_s23, %s378_s26 }
 0x42e   : > { %s493_s24 = spop %492 }
 0x42f   : > { %s495_s25 = spop %494 }
 0x430   : > { %s406_s27 = sadd.f32 %s495_s25, %s493_s24 }
 0x432   : > { %s407_s29 = smul.f32 0.5, %s406_s27 }
 0x434   : > { %s408_s30 = ssub.f32 %s405_s28, %s407_s29 }
 0x436   : > { %s409_s4 = smax.f32 %s564_s3, %s408_s30 }
 0x437   : > { %411 = sst [smem:[#allocation4]] %s409_s4 }
 0x438 PF: > { %p500_p6 = scmp.eq.s32.totalorder %s587_s10, 2  ;;  %s418_s7 = sshll.u32 %s626_s2, 4  ;;  %s419_s7 = int_to_ptr.hbm [resolvable:$true] %s418_s7 }
 0x439   : > { %s565_s8 = smov [#allocation4]  }
 0x43a   : > { %497 = dma.smem_to_hbm (%p500_p6), %s565_s8, 16, %s419_s7, [#allocation5]  }
 0x43b   : > { %551 = dma.done.wait (%p500_p6), [#allocation5], 16  }
 0x43c   : > { %553 = vsyncadd (%p500_p6), [#allocation5], 4294967280 }
 0x43d   : > { %427 = sfence }
 0x43e PF: > { %s13_s9 = sadd.s32 1, %s556_s9  }
 0x43f   : > { %p10_p7 = scmp.ge.s32.totalorder %s13_s9, 5  }
 0x441   :  { %12 = sbr.rel (!%p10_p7) target bundleno = 1 (0x1), region = 67 }
 0x446   :  { %433 = vsyncpa [#allocation5], 1 }
 0x447   :  { %435 = vsyncpa [#allocation5 + $0x1], 1 }

</bundles_post_ra>
